<compile_context>
chip_gen: v7x
topology: tpu7x:2x2x1
jax: 0.10.0
libtpu: 0.0.40
codegen_flags: <defaults>
</compile_context>

<pallas_src>
import functools

import jax
import jax.numpy as jnp
from jax.experimental import pallas as pl
from jax.experimental.pallas import tpu as pltpu

LANE = 128
SUBLANE = 8


def _round_up(x: int, m: int) -> int:
    return (x + m - 1) // m * m


# ----------------------------------------------------------------------------
# Pallas kernel: lang_cls = Dropout(eval, identity) + Linear(lang_size -> C).
# Single invocation (no grid, no pipeline), whole-array VMEM refs.
#   emb: (Bp, H)   w: (H, Cp)   b: (1, Cp)   ->   scores: (Bp, Cp)
# ----------------------------------------------------------------------------
def _lang_cls_kernel(emb_ref, w_ref, b_ref, scores_ref):
    scores = jnp.dot(emb_ref[...], w_ref[...],
                     preferred_element_type=jnp.float32)   # MXU, f32 accumulate
    scores_ref[...] = (scores + b_ref[...]).astype(scores_ref.dtype)


# ----------------------------------------------------------------------------
# One-time parameter preparation (transpose + lane-pad hoisted out of forward)
# ----------------------------------------------------------------------------
def prepare_params(params):
    """Pre-transpose nn.Linear weight to (H, Cp) and zero-pad C up to a
    multiple of 128 lanes so the kernel output is lane-dense."""
    w = params["lang_cls_w"]              # (C, H) — PyTorch nn.Linear layout
    b = params["lang_cls_b"]              # (C,)
    C, H = w.shape
    Cp = max(_round_up(C, LANE), LANE)
    w_t_pad = jnp.zeros((H, Cp), w.dtype).at[:, :C].set(w.T)
    b_pad = jnp.zeros((1, Cp), b.dtype).at[:, :C].set(b[None, :])
    return {"w_t_pad": w_t_pad, "b_pad": b_pad, "num_classes": C}


# ----------------------------------------------------------------------------
# Forward — one jit: pad, Pallas classifier, un-pad slice, mask, passthroughs
# ----------------------------------------------------------------------------
@functools.partial(jax.jit, static_argnums=(3,))
def _forward_impl(data_dict, w_t, b_p, num_classes):
    word_rep = data_dict["lang_feat_last_hidden_state"]   # (B, T, H)
    pooler = data_dict["lang_feat_pooler_output"]          # (B, H)
    attn_mask = data_dict["lang_feat_attention_mask"]      # (B, T) int
    lang_emb = data_dict["lang_emb"]                        # (B, lang_size)

    B, T, _ = word_rep.shape
    Hl = lang_emb.shape[1]
    Cp = w_t.shape[1]
    Bp = max(_round_up(B, SUBLANE), SUBLANE)

    # Pad batch to a full sublane group -> unmasked vst for the (Bp, Cp) store
    # and full (8,128)-shaped vreg loads.  Fuses inside this jit.
    emb_pad = jnp.zeros((Bp, Hl), lang_emb.dtype).at[:B, :].set(lang_emb)

    scores_pad = pl.pallas_call(
        _lang_cls_kernel,
        out_shape=jax.ShapeDtypeStruct((Bp, Cp), jnp.float32),
        in_specs=[
            pl.BlockSpec(memory_space=pltpu.MemorySpace.VMEM),   # lang_emb (padded)
            pl.BlockSpec(memory_space=pltpu.MemorySpace.VMEM),   # W^T (lane-padded)
            pl.BlockSpec(memory_space=pltpu.MemorySpace.VMEM),   # bias (lane-padded)
        ],
        out_specs=pl.BlockSpec(memory_space=pltpu.MemorySpace.VMEM),
        cost_estimate=pl.CostEstimate(
            flops=2 * Bp * Hl * Cp,
            transcendentals=0,
            bytes_accessed=4 * (Bp * Hl + Hl * Cp + Cp + Bp * Cp),
        ),
    )(emb_pad, w_t, b_p)

    out = dict(data_dict)
    # word_drop (eval) == identity -> pure passthrough, no kernel copy.
    out["lang_out"] = word_rep
    out["lang_embed"] = pooler
    # Module's reachable (BERT/CLIP) branch: lang_mask = ~attention_mask[:, :T]
    out["lang_mask"] = jnp.logical_not(attn_mask[:, :T].astype(jnp.bool_))
    # un-pad slice fuses into this jit (no standalone slice dispatch)
    out["lang_scores"] = scores_pad[:B, :num_classes]
    return out


def lang_module_forward(data_dict, prepared):
    """Pallas/JAX implementation of LangModule.forward (inference semantics)."""
    return _forward_impl(data_dict, prepared["w_t_pad"], prepared["b_pad"],
                         prepared["num_classes"])


if __name__ == "__main__":
    # Small shapes consistent with the module: batch=2, seq=8, hidden_size=32,
    # num_object_class=18, use_bidir=False -> lang_size = hidden_size = 32.
    B, T, H, C = 2, 8, 32, 18

    key = jax.random.PRNGKey(0)
    k1, k2, k3, k4, k5 = jax.random.split(key, 5)

    word_rep = jax.random.normal(k1, (B, T, H), dtype=jnp.float32)
    pooler = jax.random.normal(k2, (B, H), dtype=jnp.float32)
    lang_emb = jax.random.normal(k3, (B, H), dtype=jnp.float32)

    # attention_mask: 1 = real token, 0 = padding (so lang_mask has True entries)
    attn_mask = jnp.ones((B, T), dtype=jnp.int32)
    attn_mask = attn_mask.at[0, T - 1].set(0).at[1, T - 2:].set(0)

    # Deterministic parameters for nn.Linear(lang_size, num_object_class):
    #   weight: (C, H), bias: (C,)
    params = {
        "lang_cls_w": jax.random.normal(k4, (C, H), dtype=jnp.float32) * 0.05,
        "lang_cls_b": jax.random.normal(k5, (C,), dtype=jnp.float32) * 0.01,
    }
    prepared = prepare_params(params)   # one-time transpose + lane-pad

    data_dict = {
        "lang_feat_last_hidden_state": word_rep,
        "lang_feat_pooler_output": pooler,
        "lang_feat_attention_mask": attn_mask,
        "lang_emb": lang_emb,
    }

    out = lang_module_forward(data_dict, prepared)
    jax.block_until_ready(out["lang_scores"])

    # sanity checks vs pure-JAX / PyTorch-semantics reference
    ref_scores = lang_emb @ params["lang_cls_w"].T + params["lang_cls_b"]
    ref_mask = attn_mask[:, :T] == 0
    assert out["lang_out"].shape == (B, T, H)
    assert out["lang_scores"].shape == (B, C)
    assert out["lang_mask"].dtype == jnp.bool_
    assert bool(jnp.all(out["lang_out"] == word_rep))
    assert bool(jnp.all(out["lang_embed"] == pooler))
    assert bool(jnp.all(out["lang_mask"] == ref_mask))
    assert bool(jnp.allclose(out["lang_scores"], ref_scores, atol=1e-5, rtol=1e-5))

    print("KERNEL_OK")
</pallas_src>

<mosaic_0001>
module attributes {stable_mosaic.version = 11 : i64} {
  func.func @_lang_cls_kernel(%arg0: memref<8x32xf32, #tpu.memory_space<vmem>>, %arg1: memref<32x128xf32, #tpu.memory_space<vmem>>, %arg2: memref<1x128xf32, #tpu.memory_space<vmem>>, %arg3: memref<8x128xf32, #tpu.memory_space<vmem>>) attributes {dimension_semantics = [], scalar_prefetch = 0 : i64, scratch_operands = 0 : i64, tpu.core_type = #tpu.core_type<tc>} {
    %c0 = arith.constant 0 : index
    %c0_0 = arith.constant 0 : index
    %0 = vector.load %arg0[%c0, %c0_0] : memref<8x32xf32, #tpu.memory_space<vmem>>, vector<8x32xf32>
    %c0_1 = arith.constant 0 : index
    %c0_2 = arith.constant 0 : index
    %1 = vector.load %arg1[%c0_1, %c0_2] : memref<32x128xf32, #tpu.memory_space<vmem>>, vector<32x128xf32>
    %cst = arith.constant dense<0.000000e+00> : vector<8x128xf32>
    %2 = tpu.matmul %0, %1, %cst {dimension_numbers = #tpu.dot_dimension_numbers<[1], [0], [0], [1], [0, 0, 1, 1], [], []>} : vector<8x32xf32>, vector<32x128xf32>, vector<8x128xf32> -> vector<8x128xf32>
    %c0_3 = arith.constant 0 : index
    %c0_4 = arith.constant 0 : index
    %3 = vector.load %arg2[%c0_3, %c0_4] : memref<1x128xf32, #tpu.memory_space<vmem>>, vector<1x128xf32>
    %4 = vector.broadcast %3 : vector<1x128xf32> to vector<8x128xf32>
    %5 = arith.addf %2, %4 : vector<8x128xf32>
    %c0_5 = arith.constant 0 : index
    %c0_6 = arith.constant 0 : index
    %6 = vector.load %arg3[%c0_5, %c0_6] : memref<8x128xf32, #tpu.memory_space<vmem>>, vector<8x128xf32>
    tpu.vector_store %arg3[%c0_5, %c0_6], %5 {strides = array<i32>} : memref<8x128xf32, #tpu.memory_space<vmem>>, vector<8x128xf32>,
    return
  }
}

</mosaic_0001>

<bundles_post_ra>
// kernel: _forward_impl.1
= control target key start
LH: loop header
LB: loop body
LE: loop exit
PB: predicated region body
PF: predicated region fallthrough
CT: control target
= control target key end

     0   :  { %8 = vsyncpa [#allocation3], 0  ;;  %s174_s12 = smov [#allocation2]   ;;  %s221_s0 = inlined_call_operand.vmem [shape: f32[8,32], index: 0, kind: input, shape index: {}]   ;;  %s222_s1 = inlined_call_operand.hbm [shape: f32[32,128], index: 1, kind: input, shape index: {}]   ;;  %s223_s2 = inlined_call_operand.vmem [shape: f32[1,128], index: 2, kind: input, shape index: {}]   ;;  %s224_s3 = inlined_call_operand.vmem [shape: f32[8,128], index: 3, kind: output, shape index: {}]  }
   0x1   :  { %s16_s13 = sshll.u32 %s174_s12, 4  ;;  %s150_s16 = scalar_lea.hbm %s222_s1, 512  ;;  %s17_s13 = int_to_ptr.vmem [resolvable:$true] %s16_s13 }
   0x2   :  { %p151_p0 = scmp.ne.s32.totalorder %s222_s1, %s150_s16  ;;  %p154_p1 = scmp.lt.u32.totalorder %s150_s16, %s222_s1 }
   0x4   :  { %p156_p2 = pnand %p154_p1, %p151_p0 }
   0x6   :  { %159 = shalt.err (!%p156_p2)
}
   0x7   :  { %s160_s21 = scalar_lea.vmem %s17_s13, 512  ;;  %p165_p4 = scmp.lt.s32.totalorder %s17_s13, %s17_s13 }
   0x8   :  { %p161_p3 = scmp.ne.s32.totalorder %s17_s13, %s160_s21  ;;  %p166_p5 = scmp.lt.s32.totalorder %s160_s21, %s160_s21 }
   0xa   :  { %p167_p6 = por %p166_p5, %p165_p4 }
   0xc   :  { %p168_p7 = pnand %p167_p6, %p161_p3 }
   0xe   :  { %171 = shalt.err (!%p168_p7)
}
   0xf   :  { %s175_s22 = smov 128   ;;  %s176_s23 = smov 8  }
  0x10   :  { %22 = dma.hbm_to_vmem [thread:$0]  %s222_s1, 512, %s17_s13, [#allocation3], %s175_s22, %s175_s22, %s176_s23  }
  0x11   :  { %172 = dma.done.wait [#allocation3], 512  }
  0x12   :  { %173 = vsyncadd [#allocation3], 4294966784  ;;  %v177_v0 = vmov 0.0|0.0   ;;  %vm178_vm0 = vmmov 0   ;;  %v179_v1 = vmov 0.0   ;;  %v29_v2 = vld [vmem:[#allocation2] sm:$0xff] }
  0x13   :  { %138 = vmatprep.subr.bf16.mxu0 %v177_v0  ;;  %135 = vmatprep.mubr.msk.f32.mxu0 %vm178_vm0, %v179_v1  ;;  %v30_v3 = vld [vmem:[#allocation2 + $0x8] sm:$0xff]  ;;  %v31_v4 = vld [vmem:[#allocation2 + $0x10] sm:$0xff]  ;;  %v32_v6 = vld [vmem:[#allocation2 + $0x18] sm:$0xff]  ;;  %vm40_vm1 = vcmask 261120  }
  0x14   :  { %v139_v5 = vpack.c.bf16 %v30_v3, %v29_v2  ;;  %v142_v7 = vpack.c.bf16 %v32_v6, %v31_v4  ;;  %v28_v8 = vld [vmem:[%s221_s0] sm:$0xff] }
  0x15   :  { %v120_v9 = vld [vmem:[%s223_s2] ss:$0 sm:$0xff] }
  0x16   :  { %140 = vmatpush3.bf16.msra.mxu0 %v139_v5 }
  0x17   :  { %141 = vmatprep.subr.bf16.mxu0 %v177_v0 }
  0x1a   :  { %143 = vmatpush3.bf16.msra.mxu0 %v142_v7 }
  0x1d   :  { %136 = vmatmul.mubr.msk.f32.vlgmr.msra.gmra.mrb[0].mxu0 %vm40_vm1, %v28_v8 }
  0xf0   :  { %v110_v10 = vpop.f32.mrb[0].mxu0 }
  0xf1   :  { %v111_v11 = vadd.f32 %v120_v9, %v110_v10  ;;  %v137_v12 = vpop.f32.mrb[1].mxu0 }
  0xf3   :  { %114 = vst [vmem:[%s224_s3] sm:$0xff] %v111_v11 }
  0xf4   :  { %119 = vsyncpa [#allocation3], 1 }

</bundles_post_ra>
